<compile_context>
chip_gen: v7x
topology: tpu7x:2x2x1
jax: 0.10.0
libtpu: 0.0.40
codegen_flags: <defaults>
</compile_context>

<pallas_src>
import functools

import jax
import jax.numpy as jnp
from jax.experimental import pallas as pl
from jax.experimental.pallas import tpu as pltpu


def _dpo_kernel(x_ref, out_ref, *, beta, inv_b):
    # x_ref: (4, B) stacked log-probs
    #   row 0 = policy_chosen, row 1 = policy_rejected,
    #   row 2 = reference_chosen, row 3 = reference_rejected
    x = x_ref[...].astype(jnp.float32)

    pc = x[0:1, :]
    pr = x[1:2, :]
    rc = x[2:3, :]
    rr = x[3:4, :]

    # logits = pi_logratios - ref_logratios
    z = beta * ((pc - pr) - (rc - rr))
    # Numerically stable -logsigmoid(z) = max(-z, 0) + log1p(exp(-|z|))
    losses = jnp.maximum(-z, 0.0) + jnp.log1p(jnp.exp(-jnp.abs(z)))

    # Reward means from per-row sums: a single cross-lane reduction over the
    # whole stacked tile, then tiny (1,1) arithmetic.
    row_sums = jnp.sum(x, axis=1, keepdims=True)          # (4, 1)
    chosen_sum = jnp.sum(row_sums[0:1, :] - row_sums[2:3, :])    # sum(pc - rc)
    rejected_sum = jnp.sum(row_sums[1:2, :] - row_sums[3:4, :])  # sum(pr - rr)

    # Scalar stores into the packed SMEM output.
    out_ref[0] = jnp.sum(losses) * inv_b
    out_ref[1] = (beta * inv_b) * chosen_sum
    out_ref[2] = (beta * inv_b) * rejected_sum


def dpo_loss(policy_chosen_logps,
             policy_rejected_logps,
             reference_chosen_logps,
             reference_rejected_logps,
             *, beta=0.1):
    """Returns (loss_mean, chosen_rewards_mean, rejected_rewards_mean)."""
    b = policy_chosen_logps.shape[0]
    # One stacked (4, B) input in its native dtype -> one input DMA.
    x = jnp.stack([policy_chosen_logps, policy_rejected_logps,
                   reference_chosen_logps, reference_rejected_logps], axis=0)

    out = pl.pallas_call(
        functools.partial(_dpo_kernel, beta=float(beta), inv_b=1.0 / float(b)),
        out_shape=jax.ShapeDtypeStruct((3,), jnp.float32),
        # Grid-less call: index_map takes no grid args (fixes previous error).
        in_specs=[pl.BlockSpec((4, b), lambda: (0, 0))],
        # Packed scalar results in SMEM: no padded (1,1) VMEM tiles / masked
        # stores, a single tiny output writeback.
        out_specs=pl.BlockSpec(memory_space=pltpu.MemorySpace.SMEM),
    )(x)

    # TODO(synk): forward-only; a custom_vjp (with stop_gradient on the
    # rewards, matching .detach()) would be needed to use this under jax.grad.
    return out[0], out[1], out[2]


def _reference(pc, pr, rc, rr, beta):
    logits = (pc - pr) - (rc - rr)
    losses = -jax.nn.log_sigmoid(beta * logits)
    chosen = beta * (pc - rc)
    rejected = beta * (pr - rr)
    return losses.mean(), chosen.mean(), rejected.mean()


if __name__ == "__main__":
    key = jax.random.PRNGKey(0)
    B = 8
    BETA = 0.1
    k1, k2, k3, k4 = jax.random.split(key, 4)
    # Log-probs are negative; scale to plausible values.
    policy_chosen = -jnp.abs(jax.random.normal(k1, (B,), jnp.float32)) * 5.0
    policy_rejected = -jnp.abs(jax.random.normal(k2, (B,), jnp.float32)) * 5.0
    ref_chosen = -jnp.abs(jax.random.normal(k3, (B,), jnp.float32)) * 5.0
    ref_rejected = -jnp.abs(jax.random.normal(k4, (B,), jnp.float32)) * 5.0

    loss, chosen_r, rejected_r = dpo_loss(
        policy_chosen, policy_rejected, ref_chosen, ref_rejected, beta=BETA)
    jax.block_until_ready((loss, chosen_r, rejected_r))

    ref_loss, ref_cr, ref_rr = _reference(
        policy_chosen, policy_rejected, ref_chosen, ref_rejected, BETA)

    assert jnp.allclose(loss, ref_loss, atol=1e-5), (loss, ref_loss)
    assert jnp.allclose(chosen_r, ref_cr, atol=1e-5), (chosen_r, ref_cr)
    assert jnp.allclose(rejected_r, ref_rr, atol=1e-5), (rejected_r, ref_rr)

    print("KERNEL_OK")
</pallas_src>

<mosaic_0001>
module attributes {stable_mosaic.version = 11 : i64} {
  func.func @_dpo_kernel(%arg0: memref<4x8xf32, #tpu.memory_space<vmem>>, %arg1: memref<3xf32, #tpu.memory_space<smem>>) attributes {dimension_semantics = [], scalar_prefetch = 0 : i64, scratch_operands = 0 : i64, tpu.core_type = #tpu.core_type<tc>} {
    %c0 = arith.constant 0 : index
    %c0_0 = arith.constant 0 : index
    %0 = vector.load %arg0[%c0, %c0_0] : memref<4x8xf32, #tpu.memory_space<vmem>>, vector<4x8xf32>
    %1 = vector.extract_strided_slice %0 {offsets = [0, 0], sizes = [1, 8], strides = [1, 1]} : vector<4x8xf32> to vector<1x8xf32>
    %2 = vector.extract_strided_slice %0 {offsets = [1, 0], sizes = [1, 8], strides = [1, 1]} : vector<4x8xf32> to vector<1x8xf32>
    %3 = vector.extract_strided_slice %0 {offsets = [2, 0], sizes = [1, 8], strides = [1, 1]} : vector<4x8xf32> to vector<1x8xf32>
    %4 = vector.extract_strided_slice %0 {offsets = [3, 0], sizes = [1, 8], strides = [1, 1]} : vector<4x8xf32> to vector<1x8xf32>
    %5 = arith.subf %1, %2 : vector<1x8xf32>
    %6 = arith.subf %3, %4 : vector<1x8xf32>
    %7 = arith.subf %5, %6 : vector<1x8xf32>
    %cst = arith.constant 1.000000e-01 : f32
    %8 = vector.broadcast %cst : f32 to vector<1x8xf32>
    %9 = arith.mulf %8, %7 : vector<1x8xf32>
    %cst_1 = arith.constant 0.000000e+00 : f32
    %10 = vector.broadcast %cst_1 : f32 to vector<1x8xf32>
    %11 = arith.subf %10, %9 : vector<1x8xf32>
    %cst_2 = arith.constant 0.000000e+00 : f32
    %12 = vector.broadcast %cst_2 : f32 to vector<1x8xf32>
    %13 = arith.maximumf %11, %12 : vector<1x8xf32>
    %14 = math.absf %9 : vector<1x8xf32>
    %cst_3 = arith.constant 0.000000e+00 : f32
    %15 = vector.broadcast %cst_3 : f32 to vector<1x8xf32>
    %16 = arith.subf %15, %14 : vector<1x8xf32>
    %17 = math.exp %16 : vector<1x8xf32>
    %18 = math.log1p %17 : vector<1x8xf32>
    %19 = arith.addf %13, %18 : vector<1x8xf32>
    %cst_4 = arith.constant dense<0.000000e+00> : vector<4xf32>
    %20 = vector.multi_reduction <add>, %0, %cst_4 [1] : vector<4x8xf32> to vector<4xf32>
    %21 = vector.shape_cast %20 : vector<4xf32> to vector<4x1xf32>
    %22 = vector.extract_strided_slice %21 {offsets = [0, 0], sizes = [1, 1], strides = [1, 1]} : vector<4x1xf32> to vector<1x1xf32>
    %23 = vector.extract_strided_slice %21 {offsets = [2, 0], sizes = [1, 1], strides = [1, 1]} : vector<4x1xf32> to vector<1x1xf32>
    %24 = arith.subf %22, %23 : vector<1x1xf32>
    %25 = vector.shape_cast %24 : vector<1x1xf32> to vector<1x1x1xf32>
    %cst_5 = arith.constant dense<0.000000e+00> : vector<1xf32>
    %26 = vector.multi_reduction <add>, %25, %cst_5 [1, 2] : vector<1x1x1xf32> to vector<1xf32>
    %27 = vector.shape_cast %26 : vector<1xf32> to vector<1x1x1xf32>
    %28 = vector.extract %27[0, 0, 0] : f32 from vector<1x1x1xf32>
    %29 = vector.extract_strided_slice %21 {offsets = [1, 0], sizes = [1, 1], strides = [1, 1]} : vector<4x1xf32> to vector<1x1xf32>
    %30 = vector.extract_strided_slice %21 {offsets = [3, 0], sizes = [1, 1], strides = [1, 1]} : vector<4x1xf32> to vector<1x1xf32>
    %31 = arith.subf %29, %30 : vector<1x1xf32>
    %32 = vector.shape_cast %31 : vector<1x1xf32> to vector<1x1x1xf32>
    %cst_6 = arith.constant dense<0.000000e+00> : vector<1xf32>
    %33 = vector.multi_reduction <add>, %32, %cst_6 [1, 2] : vector<1x1x1xf32> to vector<1xf32>
    %34 = vector.shape_cast %33 : vector<1xf32> to vector<1x1x1xf32>
    %35 = vector.extract %34[0, 0, 0] : f32 from vector<1x1x1xf32>
    %36 = vector.shape_cast %19 : vector<1x8xf32> to vector<1x1x8xf32>
    %cst_7 = arith.constant dense<0.000000e+00> : vector<1xf32>
    %37 = vector.multi_reduction <add>, %36, %cst_7 [1, 2] : vector<1x1x8xf32> to vector<1xf32>
    %38 = vector.shape_cast %37 : vector<1xf32> to vector<1x1x1xf32>
    %39 = vector.extract %38[0, 0, 0] : f32 from vector<1x1x1xf32>
    %cst_8 = arith.constant 1.250000e-01 : f32
    %40 = arith.mulf %39, %cst_8 : f32
    %c0_9 = arith.constant 0 : index
    %41 = memref.load %arg1[%c0_9] : memref<3xf32, #tpu.memory_space<smem>>
    memref.store %40, %arg1[%c0_9] : memref<3xf32, #tpu.memory_space<smem>>
    %cst_10 = arith.constant 1.250000e-02 : f32
    %42 = arith.mulf %cst_10, %28 : f32
    %c1 = arith.constant 1 : index
    %43 = memref.load %arg1[%c1] : memref<3xf32, #tpu.memory_space<smem>>
    memref.store %42, %arg1[%c1] : memref<3xf32, #tpu.memory_space<smem>>
    %cst_11 = arith.constant 1.250000e-02 : f32
    %44 = arith.mulf %cst_11, %35 : f32
    %c2 = arith.constant 2 : index
    %45 = memref.load %arg1[%c2] : memref<3xf32, #tpu.memory_space<smem>>
    memref.store %44, %arg1[%c2] : memref<3xf32, #tpu.memory_space<smem>>
    return
  }
}

</mosaic_0001>

<bundles_post_ra>
// kernel: tpu_custom_call.1
= control target key start
LH: loop header
LB: loop body
LE: loop exit
PB: predicated region body
PF: predicated region fallthrough
CT: control target
= control target key end

     0   :  { %6 = vsyncpa [#allocation3], 0  ;;  %s179_s0 = inlined_call_operand.hbm [shape: f32[4,8], index: 0, kind: input, shape index: {}]   ;;  %s180_s1 = inlined_call_operand.hbm [shape: f32[3], index: 1, kind: output, shape index: {}]  }
   0x1   :  { %7 = vsyncpa [#allocation4], 0  ;;  %s143_s6 = smov [#allocation2]   ;;  %s107_s10 = scalar_lea.hbm %s179_s0, 64 }
   0x2   :  { %s14_s7 = sshll.u32 %s143_s6, 4  ;;  %p108_p0 = scmp.ne.s32.totalorder %s179_s0, %s107_s10  ;;  %s15_s7 = int_to_ptr.vmem [resolvable:$true] %s14_s7 }
   0x3   :  { %p111_p1 = scmp.lt.u32.totalorder %s107_s10, %s179_s0 }
   0x5   :  { %p113_p2 = pnand %p111_p1, %p108_p0 }
   0x7   :  { %116 = shalt.err (!%p113_p2)
}
   0x8   :  { %s117_s15 = scalar_lea.vmem %s15_s7, 64  ;;  %p122_p4 = scmp.lt.s32.totalorder %s15_s7, %s15_s7 }
   0x9   :  { %p118_p3 = scmp.ne.s32.totalorder %s15_s7, %s117_s15  ;;  %p123_p5 = scmp.lt.s32.totalorder %s117_s15, %s117_s15 }
   0xb   :  { %p124_p6 = por %p123_p5, %p122_p4 }
   0xd   :  { %p125_p7 = pnand %p124_p6, %p118_p3 }
   0xf   :  { %128 = shalt.err (!%p125_p7)
}
  0x10   :  { %17 = dma.hbm_to_vmem [thread:$0]  %s179_s0, 64, %s15_s7, [#allocation3]  }
  0x11   :  { %139 = dma.done.wait [#allocation3], 64  }
  0x12   :  { %140 = vsyncadd [#allocation3], 4294967232  ;;  %v21_v0 = vld [vmem:[#allocation2] sm:$0xf]  ;;  %vm61_vm1 = vcmask 57344   ;;  %vm47_vm2 = vcmask 60416  }
  0x13   :  { %v23_v1 = vrot.slane %v21_v0, 1  ;;  %v48_v22 = vsel %vm47_vm2, %v21_v0, 0.0  ;;  %s129_s25 = scalar_lea.hbm %s180_s1, 16 }
  0x14   :  { %p130_p8 = scmp.ne.s32.totalorder %s180_s1, %s129_s25  ;;  %p133_p9 = scmp.lt.u32.totalorder %s129_s25, %s180_s1 }
  0x15   :  { %v25_v2 = vsub.f32 %v21_v0, %v23_v1 }
  0x16   :  { %p135_p10 = pnand %p133_p9, %p130_p8 }
  0x17   :  { %v27_v3 = vrot.slane %v25_v2, 2 }
  0x19   :  { %v29_v4 = vsub.f32 %v25_v2, %v27_v3 }
  0x1b   :  { %v30_v5 = vmul.f32 0.1, %v29_v4 }
  0x1d   :  { %v33_v6 = vand.u32 2147483647, %v30_v5  ;;  %v31_v13 = vsub.f32 0.0, %v30_v5 }
  0x1f   :  { %v34_v7 = vsub.f32 0.0, %v33_v6  ;;  %v32_v17 = vmax.f32 %v31_v13, 0.0 }
  0x21   :  { %v35_v8 = vmul.f32 1.442695, %v34_v7 }
  0x23   :  { %103 = vpow2.f32 %v35_v8 }
  0x2d   :  { %v104_v9 = vpop.eup %103 }
  0x2e   :  { %v37_v10 = vadd.f32 1.0, %v104_v9  ;;  %v40_v11 = vmul.f32 -0.5, %v104_v9  ;;  %v43_v14 = vand.u32 2147483647, %v104_v9 }
  0x30   :  { %105 = vlog2.f32 %v37_v10  ;;  %v41_v12 = vadd.f32 1.0, %v40_v11  ;;  %vm44_vm0 = vcmp.lt.f32.partialorder %v43_v14, 0.0004427343 }
  0x32   :  { %v42_v15 = vmul.f32 %v104_v9, %v41_v12 }
  0x3a   :  { %v106_v16 = vpop.eup %105 }
  0x3b   :  { %v39_v18 = vmul.f32 0.6931472, %v106_v16 }
  0x3d   :  { %v45_v19 = vsel %vm44_vm0, %v42_v15, %v39_v18 }
  0x3e   :  { %v46_v20 = vadd.f32 %v45_v19, %v32_v17 }
  0x40   :  { %v62_v21 = vsel %vm61_vm1, %v46_v20, 0.0 }
  0x41   :  { %63 = vadd.xlane.f32.xlu0 %v62_v21 }
  0x45   :  { %49 = vadd.xlane.f32.xlu0 %v48_v22 }
  0xce   :  { %v64_v23 = vpop.xlane.xlu0 %63 }
  0xcf   :  { %v65_v24 = vrot.slane %v64_v23, 4 }
  0xd1   :  { %v66_v25 = vadd.f32 %v65_v24, %v64_v23 }
  0xd2   :  { %v50_v26 = vpop.xlane.xlu0 %49 }
  0xd3   :  { %v67_v27 = vrot.slane %v66_v25, 2  ;;  %v52_v28 = vrot.slane %v50_v26, 2 }
  0xd5   :  { %v54_v29 = vsub.f32 %v50_v26, %v52_v28  ;;  %v68_v30 = vadd.f32 %v67_v27, %v66_v25 }
  0xd7   :  { %95 = vpush %v54_v29  ;;  %v58_v31 = vrot.slane %v54_v29, 1  ;;  %v69_v32 = vrot.slane %v68_v30, 1 }
  0xd9   :  { %97 = vpush %v58_v31  ;;  %v70_v33 = vadd.f32 %v69_v32, %v68_v30 }
  0xdb   :  { %99 = vpush %v70_v33 }
 0x108   :  { %s96_s0 = spop %95 }
 0x109   :  { %s75_s18 = smul.f32 0.0125, %s96_s0 }
 0x10a   :  { %s98_s19 = spop %97 }
 0x10b   :  { %77 = sst [smem:[#allocation5 + $0x1]] %s75_s18  ;;  %s78_s20 = smul.f32 0.0125, %s98_s19 }
 0x10c   :  { %s100_s21 = spop %99 }
 0x10d   :  { %80 = sst [smem:[#allocation5 + $0x2]] %s78_s20  ;;  %s72_s22 = smul.f32 0.125, %s100_s21 }
 0x10f   :  { %74 = sst [smem:[#allocation5]] %s72_s22 }
 0x110   :  { %138 = shalt.err (!%p135_p10)
}
 0x111   :  { %s144_s30 = smov [#allocation5]  }
 0x112   :  { %88 = dma.smem_to_hbm %s144_s30, 16, %s180_s1, [#allocation4]  }
 0x113   :  { %141 = dma.done.wait [#allocation4], 16  }
 0x114   :  { %142 = vsyncadd [#allocation4], 4294967280 }
 0x115   :  { %92 = sfence }
 0x116   :  { %93 = vsyncpa [#allocation3], 1 }
 0x117   :  { %94 = vsyncpa [#allocation4], 1 }

</bundles_post_ra>
